<compile_context>
chip_gen: v7x
topology: tpu7x:2x2x1
jax: 0.10.0
libtpu: 0.0.40
codegen_flags: <defaults>
</compile_context>

<pallas_src>
import jax
import jax.numpy as jnp
from jax import lax
from jax.experimental import pallas as pl
from jax.experimental.pallas import tpu as pltpu

NEG_INF_FILL = -1000000000000.0  # matches masked_fill value in the PyTorch module

# Budget for the pipeline's VMEM blocks (well under every chip's scoped default:
# v5e 16 MiB, v6e/v7x 32 MiB) leaving headroom for compiler temporaries.
_VMEM_BLOCK_BUDGET = 10 * 1024 * 1024


def attn_slot_kernel(hidden_ref, outputs_ref, mask_ref, out_ref):
    # hidden_ref : (TQ, H)  query tile (leading batch dim squeezed)
    # outputs_ref: (L,  H)  keys == values, resident for the whole batch item
    # mask_ref   : (TQ, L)  int8, nonzero where masked
    # out_ref    : (TQ, H)
    q_bf = hidden_ref[...].astype(jnp.bfloat16)          # bf16 MXU operands,
    kv_bf = outputs_ref[...].astype(jnp.bfloat16)        # f32 accumulation below

    # energies = Q @ K^T (contraction over H); no transpose materialized.
    scores = lax.dot_general(q_bf, kv_bf, (((1,), (1,)), ((), ())),
                             preferred_element_type=jnp.float32)      # (TQ, L)

    # Exact masked_fill semantics (fully-masked rows -> uniform 1/L like torch).
    scores = jnp.where(mask_ref[...] != 0, NEG_INF_FILL, scores)

    # Numerically stable softmax; the divide is deferred to the EUP reciprocal
    # and applied to the smaller (TQ, H) context instead of (TQ, L) alpha.
    s_max = jnp.max(scores, axis=-1, keepdims=True)
    p = jnp.exp(scores - s_max)                                        # (TQ, L)
    denom = jnp.sum(p, axis=-1, keepdims=True)                         # (TQ, 1)

    ctx = jnp.dot(p.astype(jnp.bfloat16), kv_bf,
                  preferred_element_type=jnp.float32)                  # (TQ, H)
    out_ref[...] = (ctx * pl.reciprocal(denom, approx=True)).astype(out_ref.dtype)


def _block_footprint_bytes(tq, L, H):
    q_blk = 2 * tq * H * 4          # double-buffered query tile (f32)
    o_blk = 2 * tq * H * 4          # double-buffered output tile (f32)
    m_blk = 2 * tq * L * 1          # double-buffered int8 mask tile
    kv_blk = 1 * L * H * 4          # single-buffered resident KV (f32)
    tmp = 3 * tq * L * 4            # scores / p temporaries (f32) + slack
    return q_blk + o_blk + m_blk + kv_blk + tmp


def _choose_query_tile(Q, L, H):
    candidates = [t for t in (512, 256, 128) if Q % t == 0]
    if not candidates:
        return Q                    # small / odd Q: full-dim block is layout-legal
    for t in candidates:            # largest tile that fits the VMEM budget
        if _block_footprint_bytes(t, L, H) <= _VMEM_BLOCK_BUDGET:
            return t
    return candidates[-1]


def attn_slot(hidden, outputs, mask):
    """hidden (B,Q,H) queries; outputs (B,L,H) keys/values; mask (B,Q,L) bool."""
    B, Q, H = hidden.shape
    _, L, _ = outputs.shape
    TQ = _choose_query_tile(Q, L, H)

    # int8 mask: 4x less HBM/VMEM traffic than an f32 copy; compared !=0 in-kernel.
    mask_i8 = mask.astype(jnp.int8)

    itemsize = hidden.dtype.itemsize
    cost = pl.CostEstimate(
        flops=4 * B * Q * L * H,                       # two matmuls
        transcendentals=B * Q * L,                     # exp
        bytes_accessed=(hidden.size * itemsize + outputs.size * itemsize
                        + mask_i8.size + B * Q * H * itemsize),
    )

    out = pl.pallas_call(
        attn_slot_kernel,
        out_shape=jax.ShapeDtypeStruct((B, Q, H), hidden.dtype),
        grid_spec=pltpu.PrefetchScalarGridSpec(
            num_scalar_prefetch=0,
            grid=(B, Q // TQ),
            in_specs=[
                # queries: tiled over Q, double-buffered by default
                pl.BlockSpec((None, TQ, H), lambda b, qi: (b, qi, 0)),
                # keys/values: resident per batch item; single-buffer (index only
                # changes on the outer b axis, double-buffering wastes VMEM)
                pl.BlockSpec((None, L, H), lambda b, qi: (b, 0, 0),
                             pipeline_mode=pl.Buffered(1)),
                # mask: tiled over Q (int8)
                pl.BlockSpec((None, TQ, L), lambda b, qi: (b, qi, 0)),
            ],
            out_specs=pl.BlockSpec((None, TQ, H), lambda b, qi: (b, qi, 0)),
        ),
        compiler_params=pltpu.CompilerParams(
            dimension_semantics=("parallel", "parallel"),
            vmem_limit_bytes=32 * 1024 * 1024,   # >= v5e's 16 MiB scoped default
        ),
        cost_estimate=cost,
    )(hidden, outputs, mask_i8)
    return out


def attn_slot_reference(hidden, outputs, mask):
    """Pure-JAX (f32) reference of the PyTorch forward."""
    energies = jnp.einsum("bqh,blh->bql", hidden, outputs)
    energies = jnp.where(mask, NEG_INF_FILL, energies)
    alpha = jax.nn.softmax(energies, axis=-1)
    return jnp.einsum("bql,blh->bqh", alpha, outputs)


if __name__ == "__main__":
    B, Q, L, H = 2, 8, 16, 32

    key = jax.random.PRNGKey(0)
    k_h, k_o, k_m = jax.random.split(key, 3)

    hidden = jax.random.normal(k_h, (B, Q, H), jnp.float32)   # queries
    outputs = jax.random.normal(k_o, (B, L, H), jnp.float32)  # keys / values
    mask = jax.random.bernoulli(k_m, 0.25, (B, Q, L))         # True -> masked out

    ctx = attn_slot(hidden, outputs, mask)
    jax.block_until_ready(ctx)

    ref = attn_slot_reference(hidden, outputs, mask)
    assert ctx.shape == (B, Q, H)
    # bf16 MXU operands + approx reciprocal -> looser tolerance vs f32 reference.
    assert jnp.allclose(ctx, ref, atol=5e-2, rtol=5e-2), "mismatch vs reference"

    print("KERNEL_OK")
</pallas_src>

<mosaic_0001>
module attributes {stable_mosaic.version = 11 : i64} {
  func.func @attn_slot_kernel(%arg0: i32, %arg1: i32, %arg2: memref<1x8x32xf32, #tpu.memory_space<vmem>>, %arg3: memref<1x16x32xf32, #tpu.memory_space<vmem>>, %arg4: memref<1x8x16xi8, #tpu.memory_space<vmem>>, %arg5: memref<1x8x32xf32, #tpu.memory_space<vmem>>) attributes {dimension_semantics = [#tpu.dimension_semantics<parallel>, #tpu.dimension_semantics<parallel>], iteration_bounds = array<i64: 2, 1>, scalar_prefetch = 0 : i64, scratch_operands = 0 : i64, tpu.core_type = #tpu.core_type<tc>, window_params = [{transform_indices = @transform_0, window_bounds = array<i64: 1, 8, 32>}, {pipeline_mode = #tpu.pipeline_mode<synchronous>, transform_indices = @transform_1, window_bounds = array<i64: 1, 16, 32>}, {transform_indices = @transform_2, window_bounds = array<i64: 1, 8, 16>}, {transform_indices = @transform_3, window_bounds = array<i64: 1, 8, 32>}]} {
    %c0 = arith.constant 0 : index
    %c0_0 = arith.constant 0 : index
    %c0_1 = arith.constant 0 : index
    %0 = vector.load %arg2[%c0, %c0_0, %c0_1] : memref<1x8x32xf32, #tpu.memory_space<vmem>>, vector<1x8x32xf32>
    %1 = vector.shape_cast %0 : vector<1x8x32xf32> to vector<8x32xf32>
    %2 = arith.truncf %1 : vector<8x32xf32> to vector<8x32xbf16>
    %c0_2 = arith.constant 0 : index
    %c0_3 = arith.constant 0 : index
    %c0_4 = arith.constant 0 : index
    %3 = vector.load %arg3[%c0_2, %c0_3, %c0_4] : memref<1x16x32xf32, #tpu.memory_space<vmem>>, vector<1x16x32xf32>
    %4 = vector.shape_cast %3 : vector<1x16x32xf32> to vector<16x32xf32>
    %5 = arith.truncf %4 : vector<16x32xf32> to vector<16x32xbf16>
    %cst = arith.constant dense<0.000000e+00> : vector<8x16xf32>
    %6 = tpu.matmul %2, %5, %cst {dimension_numbers = #tpu.dot_dimension_numbers<[1], [1], [0], [0], [0, 0, 1, 0], [], []>} : vector<8x32xbf16>, vector<16x32xbf16>, vector<8x16xf32> -> vector<8x16xf32>
    %c0_5 = arith.constant 0 : index
    %c0_6 = arith.constant 0 : index
    %c0_7 = arith.constant 0 : index
    %7 = vector.load %arg4[%c0_5, %c0_6, %c0_7] : memref<1x8x16xi8, #tpu.memory_space<vmem>>, vector<1x8x16xi8>
    %8 = vector.shape_cast %7 : vector<1x8x16xi8> to vector<8x16xi8>
    %c0_i8 = arith.constant 0 : i8
    %9 = vector.broadcast %c0_i8 : i8 to vector<8x16xi8>
    %10 = arith.cmpi ne, %8, %9 : vector<8x16xi8>
    %cst_8 = arith.constant -9.99999995E+11 : f32
    %11 = vector.broadcast %cst_8 : f32 to vector<8x16xf32>
    %12 = arith.select %10, %11, %6 : vector<8x16xi1>, vector<8x16xf32>
    %cst_9 = arith.constant dense<0xFF800000> : vector<8xf32>
    %13 = vector.multi_reduction <maximumf>, %12, %cst_9 [1] : vector<8x16xf32> to vector<8xf32>
    %14 = vector.shape_cast %13 : vector<8xf32> to vector<8x1xf32>
    %15 = vector.broadcast %14 : vector<8x1xf32> to vector<8x16xf32>
    %16 = arith.subf %12, %15 : vector<8x16xf32>
    %17 = math.exp %16 : vector<8x16xf32>
    %cst_10 = arith.constant dense<0.000000e+00> : vector<8xf32>
    %18 = vector.multi_reduction <add>, %17, %cst_10 [1] : vector<8x16xf32> to vector<8xf32>
    %19 = vector.shape_cast %18 : vector<8xf32> to vector<8x1xf32>
    %20 = arith.truncf %17 : vector<8x16xf32> to vector<8x16xbf16>
    %cst_11 = arith.constant dense<0.000000e+00> : vector<8x32xf32>
    %21 = tpu.matmul %20, %5, %cst_11 {dimension_numbers = #tpu.dot_dimension_numbers<[1], [0], [0], [1], [0, 0, 1, 1], [], []>} : vector<8x16xbf16>, vector<16x32xbf16>, vector<8x32xf32> -> vector<8x32xf32>
    %22 = tpu.reciprocal %19 {approx = true} : vector<8x1xf32> -> vector<8x1xf32>
    %23 = vector.broadcast %22 : vector<8x1xf32> to vector<8x32xf32>
    %24 = arith.mulf %21, %23 : vector<8x32xf32>
    %c0_12 = arith.constant 0 : index
    %c0_13 = arith.constant 0 : index
    %c0_14 = arith.constant 0 : index
    %25 = vector.load %arg5[%c0_12, %c0_13, %c0_14] : memref<1x8x32xf32, #tpu.memory_space<vmem>>, vector<1x8x32xf32>
    %26 = vector.shape_cast %25 : vector<1x8x32xf32> to vector<8x32xf32>
    %27 = vector.shape_cast %24 : vector<8x32xf32> to vector<1x8x32xf32>
    tpu.vector_store %arg5[%c0_12, %c0_13, %c0_14], %27 {strides = array<i32>} : memref<1x8x32xf32, #tpu.memory_space<vmem>>, vector<1x8x32xf32>,
    return
  }
  func.func @transform_0(%arg0: i32, %arg1: i32) -> (i32, i32, i32) {
    %c0_i32 = arith.constant 0 : i32
    %c0_i32_0 = arith.constant 0 : i32
    return %arg0, %arg1, %c0_i32 : i32, i32, i32
  }
  func.func @transform_1(%arg0: i32, %arg1: i32) -> (i32, i32, i32) {
    %c0_i32 = arith.constant 0 : i32
    %c0_i32_0 = arith.constant 0 : i32
    %c0_i32_1 = arith.constant 0 : i32
    return %arg0, %c0_i32, %c0_i32_0 : i32, i32, i32
  }
  func.func @transform_2(%arg0: i32, %arg1: i32) -> (i32, i32, i32) {
    %c0_i32 = arith.constant 0 : i32
    %c0_i32_0 = arith.constant 0 : i32
    return %arg0, %arg1, %c0_i32 : i32, i32, i32
  }
  func.func @transform_3(%arg0: i32, %arg1: i32) -> (i32, i32, i32) {
    %c0_i32 = arith.constant 0 : i32
    %c0_i32_0 = arith.constant 0 : i32
    return %arg0, %arg1, %c0_i32 : i32, i32, i32
  }
}

</mosaic_0001>

<bundles_post_ra>
// kernel: tpu_custom_call.1
= control target key start
LH: loop header
LB: loop body
LE: loop exit
PB: predicated region body
PF: predicated region fallthrough
CT: control target
= control target key end

     0   :  { %8 = vsyncpa [#allocation3], 0  ;;  %s1022_s0 = inlined_call_operand.hbm [shape: f32[2,8,32], index: 0, kind: input, shape index: {}]   ;;  %s1023_s1 = inlined_call_operand.hbm [shape: f32[2,16,32], index: 1, kind: input, shape index: {}]   ;;  %s1024_s2 = inlined_call_operand.vmem [shape: s8[2,8,16], index: 2, kind: input, shape index: {}]   ;;  %s1025_s3 = inlined_call_operand.hbm [shape: f32[2,8,32], index: 3, kind: output, shape index: {}]  }
   0x1   :  { %10 = vsyncpa [#allocation3 + $0x1], 0 }
   0x2   :  { %11 = vsyncpa [#allocation6], 0 }
   0x3   :  { %12 = vsyncpa [#allocation4], 0 }
   0x4   :  { %14 = vsyncpa [#allocation4 + $0x1], 0  ;;  %s783_s12 = smov 0   ;;  %s785_s13 = smov 0  }
   0x5   :  { %s787_s14 = smov 0   ;;  %s789_s15 = smov 0  }
   0x6   :  { %s791_s16 = smov 0   ;;  %s793_s17 = smov 0  }
   0x7 LB: > { %s494_s18 = sadd.s32 4294967295, %s753_s17   ;;  %s495_s19 = sadd.s32 4294967294, %s753_s17   ;;  %s753_s17 = sphi %s793_s17, %s20_s17   ;;  %s749_s16 = sphi %s791_s16, %s1044_s16   ;;  %s745_s15 = sphi %s789_s15, %s1043_s15   ;;  %s741_s14 = sphi %s787_s14, %s1042_s14   ;;  %s737_s13 = sphi %s785_s13, %s1041_s13   ;;  %s733_s12 = sphi %s783_s12, %s1040_s12  }
   0x8   : > { %p54_p0 = scmp.ne.s32.totalorder %s737_s13, %s733_s12  ;;  %p55_p1 = scmp.eq.s32.totalorder %s494_s18, 0 }
   0x9   : > { %p140_p2 = scmp.eq.s32.totalorder %s495_s19, 1  ;;  %p496_p3 = scmp.ge.s32.totalorder %s753_s17, 1 }
   0xa   : > { %p820_p4 = por %p55_p1, %p54_p0  ;;  %p147_p5 = scmp.lt.s32.totalorder %s753_s17, 3 }
   0xb   : > { %p825_p6 = por %p140_p2, %p54_p0  ;;  %s512_s22 = sshll.u32 %s745_s15, 8 }
   0xc   : > { %s1029_s20 = scalar_select %p820_p4, 1, 0 }
   0xd   : > { %s1030_s21 = scalar_select %p825_p6, 1, 0 }
   0xe   : > { %p830_p7 = pnand %p496_p3, %p147_p5  ;;  %s837_s26 = scalar_lea.hbm %s1023_s1, %s512_s22 }
   0xf   : > { %s755_s27 = smov [#allocation5]   ;;  %s607_s30 = scalar_lea.hbm %s837_s26, 256 }
  0x10   : > { %s1031_s23 = scalar_select %p830_p7, 1, 0 }
  0x11   : > { %p535_p8 = pneg %p830_p7  ;;  %s162_s28 = sshll.u32 %s755_s27, 4  ;;  %s841_s28 = int_to_ptr.vmem [resolvable:$true] %s162_s28 }
  0x12   : > { %p608_p11 = scmp.ne.s32.totalorder %s837_s26, %s607_s30  ;;  %s612_s6 = scalar_lea.hbm %s1023_s1, 512 }
  0x13   : > { %p845_p9 = pnand %p535_p8, %p820_p4  ;;  %p613_p1 = scmp.lt.u32.totalorder %s837_s26, %s1023_s1 }
  0x14   : > { %p614_p2 = scmp.lt.u32.totalorder %s612_s6, %s607_s30  ;;  %p616_p5 = scmp.lt.u32.totalorder %s607_s30, %s837_s26 }
  0x15   : > { %p609_p12 = pneg %p845_p9 }
  0x16   : > { %p615_p3 = por %p614_p2, %p613_p1 }
  0x17   : > { %p610_p13 = pnand %p609_p12, %p608_p11 }
  0x18   : > { %p617_p8 = por %p616_p5, %p615_p3 }
  0x19   : > { %p611_p0 = pneg %p610_p13 }
  0x1b   : > { %p618_p10 = pnand %p617_p8, %p611_p0 }
  0x1d   : > { %621 = shalt.err (!%p618_p10)
}
  0x1e   : > { %s622_s9 = scalar_lea.vmem %s841_s28, 256  ;;  %p630_p4 = scmp.lt.s32.totalorder %s841_s28, %s841_s28 }
  0x1f   : > { %p623_p11 = scmp.ne.s32.totalorder %s841_s28, %s622_s9  ;;  %p631_p7 = scmp.lt.s32.totalorder %s622_s9, %s622_s9 }
  0x21   : > { %p625_p13 = pnand %p623_p11, %p609_p12  ;;  %p632_p1 = por %p631_p7, %p630_p4 }
  0x23   : > { %p626_p6 = pneg %p625_p13 }
  0x25   : > { %p633_p2 = pnand %p632_p1, %p626_p6 }
  0x27   : > { %636 = shalt.err (!%p633_p2)
}
  0x28   : > { %s756_s10 = smov 128   ;;  %s757_s11 = smov 8  }
  0x29   : > { %538 = dma.hbm_to_vmem [thread:$0]  (!%p845_p9), %s837_s26, 256, %s841_s28, [#allocation6], %s756_s10, %s756_s10, %s757_s11  }
  0x2a   : > { %s32_s19 = sadd.s32 1, %s749_s16  ;;  %s41_s22 = sadd.s32 1, %s741_s14 }
  0x2b   : > { %p34_p4 = scmp.ge.s32.totalorder %s32_s19, 2  ;;  %p48_p6 = scmp.ne.s32.totalorder %s741_s14, %s737_s13 }
  0x2c   : > { %p49_p7 = scmp.eq.s32.totalorder %s753_s17, 0  ;;  %p134_p12 = scmp.eq.s32.totalorder %s494_s18, 1 }
  0x2d   : > { %s1046_s19 = smov (%p34_p4, %s32_s19), 0  ;;  %p547_p0 = scmp.lt.s32.totalorder %s753_s17, 2 }
  0x2e   : > { %p883_p10 = por %p49_p7, %p48_p6  ;;  %s36_s25 = ssub.s32 %s749_s16, %s1046_s19 }
  0x2f   : > { %p39_p3 = scmp.eq.s32.totalorder %s36_s25, 0  ;;  %p892_p5 = por %p134_p12, %p48_p6 }
  0x30   : > { %s176_s27 = sand.u32 1, %s741_s14   ;;  %s501_s28 = sshll.u32 %s749_s16, 7 }
  0x31   : > { %s899_s29 = scalar_select %p39_p3, %s741_s14, %s41_s22  }
  0x32   : > { %s500_s30 = sshll.u32 %s176_s27, 3  ;;  %s904_s6 = scalar_lea.hbm %s1022_s0, %s501_s28 }
  0x33   : > { %s180_s18 = scalar_lea.vmem [#allocation2], %s500_s30  ;;  %p908_p9 = pnand %p547_p0, %p883_p10 }
  0x34   : > { %s188_s7 = sshll.u32 %s180_s18, 4  ;;  %s177_s9 = scalar_lea.sflag [#allocation3], %s176_s27  ;;  %s912_s7 = int_to_ptr.vmem [resolvable:$true] %s188_s7 }
  0x35   : > { %s637_s10 = scalar_lea.hbm %s904_s6, 128  ;;  %p639_p11 = pneg %p908_p9 }
  0x36   : > { %p638_p8 = scmp.ne.s32.totalorder %s904_s6, %s637_s10  ;;  %s642_s24 = scalar_lea.hbm %s1022_s0, 256 }
  0x37   : > { %p643_p2 = scmp.lt.u32.totalorder %s904_s6, %s1022_s0  ;;  %p644_p4 = scmp.lt.u32.totalorder %s642_s24, %s637_s10 }
  0x38   : > { %p640_p13 = pnand %p639_p11, %p638_p8  ;;  %p646_p7 = scmp.lt.u32.totalorder %s637_s10, %s904_s6 }
  0x39   : > { %p645_p6 = por %p644_p4, %p643_p2 }
  0x3a   : > { %p641_p1 = pneg %p640_p13 }
  0x3b   : > { %p647_p10 = por %p646_p7, %p645_p6 }
  0x3d   : > { %p648_p12 = pnand %p647_p10, %p641_p1 }
  0x3f   : > { %651 = shalt.err (!%p648_p12)
}
  0x40   : > { %s652_s27 = scalar_lea.vmem %s912_s7, 128  ;;  %s758_s30 = smov [#allocation2]  }
  0x41   : > { %p653_p0 = scmp.ne.s32.totalorder %s912_s7, %s652_s27  ;;  %s657_s4 = sshll.u32 %s758_s30, 4  ;;  %s658_s4 = int_to_ptr.vmem [resolvable:$false] %s657_s4 }
  0x42   : > { %s659_s5 = scalar_lea.vmem %s658_s4, 256  ;;  %p660_p13 = scmp.lt.s32.totalorder %s912_s7, %s658_s4 }
  0x43   : > { %p655_p3 = pnand %p653_p0, %p639_p11  ;;  %p661_p2 = scmp.lt.s32.totalorder %s659_s5, %s652_s27 }
  0x45   : > { %p656_p8 = pneg %p655_p3  ;;  %p662_p4 = por %p661_p2, %p660_p13 }
  0x47   : > { %p663_p6 = pnand %p662_p4, %p656_p8 }
  0x49   : > { %666 = shalt.err (!%p663_p6)
}
  0x4a   : > { %542 = dma.hbm_to_vmem [thread:$0]  (!%p908_p9), %s904_s6, 128, %s912_s7, %s177_s9  }
  0x4b   : > { %p1036_p1 = scmp.ne.s32.totalorder %s1031_s23, 0 }
  0x4c   : > { %s942_s18 = sand.u32 (!%p1036_p1), 1, %s737_s13   ;;  %p1037_p11 = scmp.ne.s32.totalorder (!%p1036_p1), %s1029_s20, 0 }
  0x4d   : > { %207 = sbr.rel (%p1036_p1) target bundleno = 699 (0x2bb), region = 32  ;;  %s503_s10 = sshll.u32 (!%p1036_p1), %s942_s18, 3 }
  0x4e   : > { %s210_s11 = scalar_lea.sflag (!%p1036_p1), [#allocation3], %s942_s18  ;;  %s213_s22 = scalar_lea.vmem (!%p1036_p1), [#allocation2], %s503_s10 }
  0x54   : > { %720 = dma.done.wait (%p1037_p11), %s210_s11, 128  }
  0x55   : > { %722 = vsyncadd (%p1037_p11), %s210_s11, 4294967168 }
  0x56   : > { %724 = dma.done.wait (%p1037_p11), [#allocation6], 256  }
  0x57   : > { %726 = vsyncadd (%p1037_p11), [#allocation6], 4294967040  ;;  %v759_v0 = vmov 0.0   ;;  %vm760_vm0 = vmmov 0   ;;  %v259_v1 = vld [vmem:[#allocation5] sm:$0xff]  ;;  %v260_v2 = vld [vmem:[#allocation5 + $0x8] sm:$0xff] }
  0x58   : > { %517 = vmatprep.subr.bf16.mxu0 %v759_v0  ;;  %519 = vmatprep.mubr.msk.bf16.mxu0 %vm760_vm0, %v759_v0  ;;  %vm262_vm1 = vcmask 261120   ;;  %v261_v3 = vpack.c.bf16 %v260_v2, %v259_v1  ;;  %v257_v5 = vld [vmem:[%s213_s22] sm:$0xff]  ;;  %p247_p9 = scmp.lt.s32.totalorder %s745_s15, 1  ;;  %v761_v8 = vmov 0   ;;  %vm315_vm4 = vcmask 130048   ;;  %s509_s9 = sshll.u32 %s745_s15, 7 }
  0x59   : > { %523 = vmatprep.subr.bf16.mxu1 %v759_v0  ;;  %525 = vmatprep.mubr.msk.bf16.mxu1 %vm760_vm0, %v759_v0  ;;  %v258_v6 = vpack.c.bf16 %v257_v5, %v257_v5  ;;  %s246_s24 = scalar_lea.vmem [#allocation7], %s503_s10  ;;  %s972_s30 = scalar_lea.hbm %s1025_s3, %s509_s9 }
  0x5a   : > { %v267_v4 = vsel %vm262_vm1, %v261_v3, 0  ;;  %524 = vmatpush3.bf16.msra.mxu1 %v261_v3  ;;  %s248_s20 = scalar_select %p247_p9, %s745_s15, 1 }
  0x5b   : > { %518 = vmatpush3.bf16.xpose.msra.mxu0 %v267_v4  ;;  %s387_s25 = sshll.u32 %s246_s24, 4  ;;  %s373_s15 = scalar_lea.sflag [#allocation4], %s942_s18  ;;  %s974_s25 = int_to_ptr.vmem [resolvable:$true] %s387_s25 }
  0x5c   : > { %s505_s23 = sshll.u32 %s248_s20, 1  ;;  %s667_s4 = scalar_lea.vmem %s974_s25, 128 }
  0x5d   : > { %s253_s8 = scalar_lea.vmem %s1024_s2, %s505_s23  ;;  %p668_p7 = scmp.ne.s32.totalorder %s974_s25, %s667_s4 }
  0x5e   : > { %v309_v7 = vld [vmem:[%s253_s8] sm:$0x3]  ;;  %s762_s5 = smov [#allocation7]  }
  0x5f   : > { %vm310_vm2 = vnez %v309_v7  ;;  %p669_p10 = pnand %p668_p7, %p892_p5  ;;  %s671_s10 = sshll.u32 %s762_s5, 4  ;;  %s672_s10 = int_to_ptr.vmem [resolvable:$false] %s671_s10 }
  0x60   : > { %v311_v9 = vsel %vm310_vm2, 16843009, %v761_v8  ;;  %s673_s11 = scalar_lea.vmem %s672_s10, 256  ;;  %p674_p0 = scmp.lt.s32.totalorder %s974_s25, %s672_s10 }
  0x61   : > { %v312_v10 = vunpack.c.0.s8 %v311_v9  ;;  %p670_p12 = pneg %p669_p10  ;;  %p675_p3 = scmp.lt.s32.totalorder %s673_s11, %s667_s4 }
  0x62   : > { %520 = vmatmul.mubr.msk.bf16.vlgmr.msra.gmra.mrb[0].mxu0 %vm262_vm1, %v258_v6 }
  0x63   : > { %vm313_vm3 = vcmp.ne.s32.totalorder %v312_v10, 0  ;;  %p676_p8 = por %p675_p3, %p674_p0 }
  0x65   : > { %p677_p13 = pnand %p676_p8, %p670_p12 }
 0x135   : > { %v303_v11 = vpop.f32.mrb[0].mxu0 }
 0x136   : > { %v314_v12 = vsel %vm313_vm3, -1e+12, %v303_v11  ;;  %v521_v13 = vpop.f32.mrb[1].mxu0 }
 0x137   : > { %v306_v14 = vpop.f32.mrb[2].mxu0  ;;  %v316_v15 = vsel %vm315_vm4, %v314_v12, -inf }
 0x138   : > { %317 = vmax.xlane.f32.xlu0 %v316_v15  ;;  %v522_v16 = vpop.f32.mrb[3].mxu0 }
 0x1c5   : > { %v318_v17 = vpop.xlane.xlu0 %317 }
 0x1c6   : > { %v319_v18 = vsub.f32 %v314_v12, %v318_v17 }
 0x1c8   : > { %v320_v19 = vmul.f32 1.442695, %v319_v18 }
 0x1ca   : > { %603 = vpow2.f32 %v320_v19 }
 0x1d4   : > { %v604_v20 = vpop.eup %603 }
 0x1d5   : > { %v322_v21 = vsel %vm315_vm4, %v604_v20, 0.0  ;;  %v325_v22 = vpack.c.bf16 %v604_v20, %v604_v20 }
 0x1d6   : > { %323 = vadd.xlane.f32.xlu0 %v322_v21 }
 0x1d7   : > { %526 = vmatmul.mubr.msk.bf16.vlgmr.msra.gmra.mrb[0].mxu1 %vm315_vm4, %v325_v22 }
 0x263   : > { %v324_v23 = vpop.xlane.xlu0 %323 }
 0x264   : > { %605 = vrcp.f32 %v324_v23 }
 0x26e   : > { %v606_v24 = vpop.eup %605 }
 0x2aa   : > { %v363_v25 = vpop.f32.mrb[0].mxu1 }
 0x2ab   : > { %v370_v26 = vmul.f32 %v606_v24, %v363_v25  ;;  %v527_v27 = vpop.f32.mrb[1].mxu1 }
 0x2ac   : > { %v366_v28 = vpop.f32.mrb[2].mxu1 }
 0x2ad   : > { %v528_v29 = vpop.f32.mrb[3].mxu1  ;;  %371 = vst.msk [vmem:[%s246_s24] sm:$0xff] %vm262_vm1, %v370_v26 }
 0x2ae   : > { %680 = shalt.err (!%p677_p13)
}
 0x2af   : > { %s681_s18 = scalar_lea.hbm %s972_s30, 128  ;;  %s685_s23 = scalar_lea.hbm %s1025_s3, 256 }
 0x2b0   : > { %p682_p2 = scmp.ne.s32.totalorder %s972_s30, %s681_s18  ;;  %p686_p1 = scmp.lt.u32.totalorder %s972_s30, %s1025_s3 }
 0x2b1   : > { %p687_p11 = scmp.lt.u32.totalorder %s685_s23, %s681_s18  ;;  %p689_p7 = scmp.lt.u32.totalorder %s681_s18, %s972_s30 }
 0x2b2   : > { %p683_p4 = pnand %p682_p2, %p892_p5 }
 0x2b3   : > { %p688_p9 = por %p687_p11, %p686_p1 }
 0x2b4   : > { %p684_p6 = pneg %p683_p4 }
 0x2b5   : > { %p690_p10 = por %p689_p7, %p688_p9 }
 0x2b7   : > { %p691_p12 = pnand %p690_p10, %p684_p6 }
 0x2b9   : > { %694 = shalt.err (!%p691_p12)
}
 0x2ba   : > { %533 = dma.vmem_to_hbm [thread:$0]  (%p892_p5), %s974_s25, 128, %s972_s30, %s373_s15  }
 0x2bb PF: > { %s399_s8 = sand.u32 1, %s733_s12   ;;  %p1038_p0 = scmp.ne.s32.totalorder %s1030_s21, 0 }
 0x2bc   : > { %p1039_p3 = scmp.ge.s32.totalorder %s753_s17, 2  ;;  %s400_s9 = scalar_lea.sflag [#allocation4], %s399_s8 }
 0x2be   : > { %p544_p8 = pnand %p1039_p3, %p1038_p0 }
 0x2c0   : > { %728 = dma.done.wait (!%p544_p8), %s400_s9, 128  }
 0x2c1   : > { %730 = vsyncadd (!%p544_p8), %s400_s9, 4294967168  ;;  %s20_s17 = sadd.s32 1, %s753_s17   ;;  %s1040_s12 = smov %s737_s13 }
 0x2c2   : > { %p17_p13 = scmp.ge.s32.totalorder %s20_s17, 4   ;;  %s1041_s13 = smov %s741_s14 }
 0x2c3   : > { %s1042_s14 = smov %s899_s29  ;;  %s1043_s15 = smov %s749_s16 }
 0x2c4   : > { %s1044_s16 = smov %s1046_s19  ;;  %19 = sbr.rel (!%p17_p13) target bundleno = 7 (0x7), region = 85 }
 0x2cb   :  { %405 = vsyncpa [#allocation3], 1 }
 0x2cc   :  { %407 = vsyncpa [#allocation3 + $0x1], 1 }
 0x2cd   :  { %408 = vsyncpa [#allocation6], 1 }
 0x2ce   :  { %409 = vsyncpa [#allocation4], 1 }
 0x2cf   :  { %411 = vsyncpa [#allocation4 + $0x1], 1 }

</bundles_post_ra>
